<compile_context>
chip_gen: v5e
topology: v5e:2x2
jax: 0.10.0
libtpu: 0.0.40
codegen_flags: <defaults>
</compile_context>

<pallas_src>
import functools

import jax
import jax.numpy as jnp
from jax import lax
from jax.experimental import pallas as pl
from jax.experimental.pallas import tpu as pltpu


def _scale_add_idx_kernel(x_ref, o_ref, *, tb):
    # grid = (batch_block, feature_block).  Global row index of each element
    # inside this (tb, tk) block = batch_block * tb + sublane iota.
    rows = pl.program_id(0) * tb + lax.broadcasted_iota(jnp.int32, x_ref.shape, 0)
    out = x_ref[...].astype(jnp.float32) * 2.0 + rows.astype(jnp.float32)
    o_ref[...] = out.astype(o_ref.dtype)


def pt_module_forward(x, *, max_block_bytes=2 * 1024 * 1024,
                      min_pallas_bytes=256 * 1024):
    """result = x * 2; result[i] += i for each leading-dim index i."""
    n = x.shape[0]
    f = 1
    for d in x.shape[1:]:
        f *= d
    itemsize = jnp.dtype(x.dtype).itemsize

    # Small-input early exit: pallas_call launch + per-step overhead dwarfs
    # the HBM time; plain XLA fuses this into one elementwise op.
    if n == 0 or f == 0 or x.size * itemsize < min_pallas_bytes:
        row_add = jnp.arange(n, dtype=jnp.float32).reshape(
            (n,) + (1,) * (x.ndim - 1))
        return (x.astype(jnp.float32) * 2.0 + row_add).astype(x.dtype)

    # Lane-dense flattened 2D view (layout plumbing only).
    x2 = x.reshape(n, f)

    # Sublane-dense batch blocking: 8 (or full n) keeps the (8,128) rule
    # whether or not n divides evenly (cdiv grid masks the ragged tail).
    tb = min(n, 8)

    # Feature tile: largest multiple of 128 fitting the per-buffer budget,
    # or the full row if it already fits.
    budget_elems = max(max_block_bytes // itemsize, 128)
    tk_budget = max(budget_elems // tb, 128)
    tk = f if f <= tk_budget else (tk_budget // 128) * 128

    grid = (pl.cdiv(n, tb), pl.cdiv(f, tk))

    out2 = pl.pallas_call(
        functools.partial(_scale_add_idx_kernel, tb=tb),
        out_shape=jax.ShapeDtypeStruct((n, f), x.dtype),
        grid_spec=pl.GridSpec(
            grid=grid,
            in_specs=[pl.BlockSpec((tb, tk), lambda i, j: (i, j))],
            out_specs=pl.BlockSpec((tb, tk), lambda i, j: (i, j)),
        ),
        compiler_params=pltpu.CompilerParams(
            dimension_semantics=("parallel", "parallel"),
        ),
        cost_estimate=pl.CostEstimate(
            flops=2 * x.size,                        # one mul + one add / elem
            transcendentals=0,
            bytes_accessed=2 * x.size * itemsize,
        ),
    )(x2)

    return out2.reshape(x.shape)


if __name__ == "__main__":
    key = jax.random.PRNGKey(0)
    k1, k2 = jax.random.split(key)

    def reference(x):
        n = x.shape[0]
        return x * 2 + jnp.arange(n, dtype=x.dtype).reshape(
            (n,) + (1,) * (x.ndim - 1))

    # 1) Module's spec shape — force the Pallas path so the kernel runs on TPU.
    x_small = jax.random.normal(k1, (2, 4, 16, 16), dtype=jnp.float32)
    out_small = jax.block_until_ready(
        pt_module_forward(x_small, min_pallas_bytes=0))
    assert jnp.allclose(out_small, reference(x_small), atol=1e-6), \
        "mismatch vs reference (small, pallas)"

    # Default path for the tiny input takes the fused-XLA early exit.
    out_fallback = jax.block_until_ready(pt_module_forward(x_small))
    assert jnp.allclose(out_fallback, reference(x_small), atol=1e-6), \
        "mismatch vs reference (small, fallback)"

    # 2) Larger input on the default Pallas path, with a shrunk tile budget to
    #    exercise the ragged (cdiv-masked) feature tiling and >1 batch block.
    x_big = jax.random.normal(k2, (16, 3, 40, 40), dtype=jnp.float32)
    out_big = jax.block_until_ready(
        pt_module_forward(x_big, max_block_bytes=64 * 1024))
    assert jnp.allclose(out_big, reference(x_big), atol=1e-6), \
        "mismatch vs reference (big, ragged tiles)"

    print("KERNEL_OK")
</pallas_src>

<mosaic_0001>
module attributes {stable_mosaic.version = 11 : i64} {
  func.func @_scale_add_idx_kernel(%arg0: i32, %arg1: i32, %arg2: memref<2x1024xf32, #tpu.memory_space<vmem>>, %arg3: memref<2x1024xf32, #tpu.memory_space<vmem>>) attributes {dimension_semantics = [#tpu.dimension_semantics<parallel>, #tpu.dimension_semantics<parallel>], iteration_bounds = array<i64: 1, 1>, scalar_prefetch = 0 : i64, scratch_operands = 0 : i64, tpu.core_type = #tpu.core_type<tc>, window_params = [{transform_indices = @transform_0, window_bounds = array<i64: 2, 1024>}, {transform_indices = @transform_1, window_bounds = array<i64: 2, 1024>}]} {
    %c2_i32 = arith.constant 2 : i32
    %0 = arith.muli %arg0, %c2_i32 : i32
    %1 = tpu.iota {dimensions = array<i32: 0>} : vector<2x1024xi32>
    %2 = vector.broadcast %0 : i32 to vector<2x1024xi32>
    %3 = arith.addi %2, %1 : vector<2x1024xi32>
    %c0 = arith.constant 0 : index
    %c0_0 = arith.constant 0 : index
    %4 = vector.load %arg2[%c0, %c0_0] : memref<2x1024xf32, #tpu.memory_space<vmem>>, vector<2x1024xf32>
    %cst = arith.constant 2.000000e+00 : f32
    %5 = vector.broadcast %cst : f32 to vector<2x1024xf32>
    %6 = arith.mulf %4, %5 : vector<2x1024xf32>
    %7 = arith.sitofp %3 : vector<2x1024xi32> to vector<2x1024xf32>
    %8 = arith.addf %6, %7 : vector<2x1024xf32>
    %c0_1 = arith.constant 0 : index
    %c0_2 = arith.constant 0 : index
    %9 = vector.load %arg3[%c0_1, %c0_2] : memref<2x1024xf32, #tpu.memory_space<vmem>>, vector<2x1024xf32>
    tpu.vector_store %arg3[%c0_1, %c0_2], %8 {strides = array<i32>} : memref<2x1024xf32, #tpu.memory_space<vmem>>, vector<2x1024xf32>,
    return
  }
  func.func @transform_0(%arg0: i32, %arg1: i32) -> (i32, i32) {
    %c0_i32 = arith.constant 0 : i32
    return %arg0, %arg1 : i32, i32
  }
  func.func @transform_1(%arg0: i32, %arg1: i32) -> (i32, i32) {
    %c0_i32 = arith.constant 0 : i32
    return %arg0, %arg1 : i32, i32
  }
}

</mosaic_0001>

<bundles_post_ra>
// kernel: tpu_custom_call.1
= control target key start
LH: loop header
LB: loop body
LE: loop exit
PB: predicated region body
PF: predicated region fallthrough
CT: control target
= control target key end

     0   :  { %6 = vsyncpa [#allocation3], 0  ;;  %s134_s0 = inlined_call_operand.hbm [shape: f32[2,1024], index: 0, kind: input, shape index: {}]   ;;  %s135_s1 = inlined_call_operand.hbm [shape: f32[2,1024], index: 1, kind: output, shape index: {}]  }
   0x1   :  { %7 = vsyncpa [#allocation4], 0  ;;  %s13_s8 = sshll.u32 %s134_s0, 4  ;;  %s115_s9 = smov [#allocation2]   ;;  %s14_s8 = int_to_ptr.hbm [resolvable:$true] %s13_s8 }
   0x2   :  { %s15_s10 = sshll.u32 %s115_s9, 4  ;;  %s16_s10 = int_to_ptr.vmem [resolvable:$true] %s15_s10 }
   0x3   :  { %18 = dma.hbm_to_vmem [thread:$0]  %s14_s8, 256, %s16_s10, [#allocation3]  }
   0x4   :  { %111 = dma.done.wait [#allocation3], 256  }
   0x5   :  { %112 = vsyncadd [#allocation3], 4294967040  ;;  %v24_v0 = vlaneseq  ;;  %v116_v1 = vmov 269488144   ;;  %v28_v7 = vld [vmem:[#allocation2] sm:$0xff]  ;;  %v29_v8 = vld [vmem:[#allocation2 + $0x8] sm:$0xff] }
   0x6   :  { %v35_v2 = vunpack.c.l.s4 %v116_v1  ;;  %v30_v9 = vmul.f32 2.0, %v28_v7  ;;  %v31_v10 = vmul.f32 2.0, %v29_v8  ;;  %s117_s11 = smov [#allocation5]   ;;  %s50_s14 = sshll.u32 %s135_s1, 4  ;;  %s51_s14 = int_to_ptr.hbm [resolvable:$true] %s50_s14 }
   0x7   :  { %v25_v3 = vshrl.u32 %v24_v0, 7  ;;  %s48_s0 = sshll.u32 %s117_s11, 4  ;;  %s49_s0 = int_to_ptr.vmem [resolvable:$true] %s48_s0 }
   0x8   :  { %v36_v4 = vunpack.c.0.s8 %v35_v2 }
   0x9   :  { %v32_v5 = vcvt.s32.f32 %v25_v3 }
   0xb   :  { %v37_v6 = vperm.slane %v32_v5, %v36_v4 }
   0xd   :  { %v39_v11 = vadd.f32 %v37_v6, %v30_v9  ;;  %v40_v12 = vadd.f32 %v37_v6, %v31_v10 }
   0xf   :  { %41 = vst [vmem:[#allocation5] sm:$0xff] %v39_v11 }
  0x10   :  { %42 = vst [vmem:[#allocation5 + $0x8] sm:$0xff] %v40_v12 }
  0x11   :  { %53 = dma.vmem_to_hbm [thread:$0]  %s49_s0, 256, %s51_s14, [#allocation4]  }
  0x12   :  { %113 = dma.done.wait [#allocation4], 256  }
  0x13   :  { %114 = vsyncadd [#allocation4], 4294967040 }
  0x14   :  { %58 = vsyncpa [#allocation3], 1 }
  0x15   :  { %59 = vsyncpa [#allocation4], 1 }

</bundles_post_ra>
